<compile_context>
chip_gen: v5e
topology: v5e:2x2
jax: 0.10.0
libtpu: 0.0.40
codegen_flags: <defaults>
</compile_context>

<pallas_src>
import jax
import jax.numpy as jnp
from jax.experimental import pallas as pl
from jax.experimental.pallas import tpu as pltpu


def se_kernel(x_ref, w1_ref, b1_ref, w2_ref, b2_ref, o_ref):
    # x_ref block: (Bt, C, HW)
    # w1_ref: (C, Crp)  fc1 weight, pre-transposed, pre-scaled by 1/HW, zero-padded lanes
    # b1_ref: (1, Crp)  zero-padded
    # w2_ref: (Crp, C)  fc2 weight, pre-transposed; padded rows are zero
    # b2_ref: (1, C)

    # Squeeze: f32-accumulated spatial sum; the mean's 1/HW is folded into w1.
    m = jnp.sum(x_ref[...].astype(jnp.float32), axis=2)                              # (Bt, C)

    # Excitation: real MXU matmuls over the whole batch tile.
    y = jnp.dot(m, w1_ref[...], preferred_element_type=jnp.float32) + b1_ref[...]    # (Bt, Crp)
    y = jnp.maximum(y, 0.0)
    s = jnp.dot(y, w2_ref[...], preferred_element_type=jnp.float32) + b2_ref[...]    # (Bt, C)
    s = jax.nn.sigmoid(s)

    # Scale: broadcast the (Bt, C, 1) gate over the lane (spatial) axis in the
    # input dtype.  s[:, :, None] moves C from lanes to sublanes (one tiny XLU
    # relayout on a (Bt, C) tensor — irrelevant to the roofline).  Re-indexing
    # x_ref here (instead of reusing a value kept live since the squeeze) avoids
    # holding the full block live across both phases.
    gate = s[:, :, None].astype(o_ref.dtype)
    o_ref[...] = (x_ref[...] * gate).astype(o_ref.dtype)


def _tpu_memory_params():
    """Generation-aware block / scoped-VMEM budgets.

    v5e/v6e (128 MiB physical VMEM, 1 TC): ~10 MiB x blocks, 64 MiB scoped limit,
        no minimum grid-step constraint (bigger tiles > extra pipeline steps).
    v7x (64 MiB physical VMEM, 2 TCs): ~6 MiB x blocks, 48 MiB scoped limit, and
        prefer >=2 grid steps so the "parallel" batch axis shards across both
        TensorCores.
    """
    vmem_phys = None
    try:
        info = pltpu.get_tpu_info()
        for attr in ("vmem_capacity_bytes", "vmem_size_bytes", "vmem_bytes"):
            v = getattr(info, attr, None)
            if v:
                vmem_phys = int(v)
                break
    except Exception:
        pass
    if vmem_phys is None:
        try:
            kind = jax.devices()[0].device_kind.lower()
            vmem_phys = (64 << 20) if "7" in kind else (128 << 20)
        except Exception:
            vmem_phys = 64 << 20  # conservative: assume v7x-sized VMEM
    if vmem_phys <= (64 << 20):  # v7x-class
        return dict(max_block_bytes=6 << 20, vmem_limit_bytes=48 << 20, min_grid_steps=2)
    return dict(max_block_bytes=10 << 20, vmem_limit_bytes=64 << 20, min_grid_steps=1)


def _choose_batch_tile(B, bytes_per_image, max_block_bytes, min_grid_steps):
    """Largest batch tile Bt such that one x block stays <= max_block_bytes,
    the grid keeps at least `min_grid_steps` steps (when possible), and Bt
    divides B evenly."""
    bt = max(1, min(B, max_block_bytes // max(1, bytes_per_image)))
    if min_grid_steps > 1 and B >= min_grid_steps:
        bt = min(bt, B // min_grid_steps)
    bt = max(1, bt)
    while B % bt:
        bt -= 1
    return bt


def se_block(x_nchw, w1, b1, w2, b2):
    """SEBlock forward.  x_nchw: (B, C, H, W); w1: (C//r, C); b1: (C//r,);
    w2: (C, C//r); b2: (C,).  Returns (B, C, H, W)."""
    B, C, H, W = x_nchw.shape
    HW = H * W
    Cr = w1.shape[0]

    # Free reshape; no padding, no post-slice — kernel writes the exact output.
    x = x_nchw.reshape(B, C, HW)

    # Host-side parameter prep (all tiny): fold 1/HW into fc1 (kept in f32 —
    # downcasting the pre-scaled weight would lose precision), pre-transpose
    # both weights, and zero-pad the fc1 width to a lane multiple so the
    # (Bt, Crp) intermediate is lane-aligned.  Zero w1 columns / zero b1 entries
    # stay zero through ReLU and the zero w2 rows contribute nothing, so the
    # result is unchanged.
    Crp = ((Cr + 127) // 128) * 128
    w1_k = jnp.pad((w1.astype(jnp.float32) * (1.0 / HW)).T, ((0, 0), (0, Crp - Cr)))  # (C, Crp)
    b1_k = jnp.pad(b1.astype(jnp.float32), (0, Crp - Cr)).reshape(1, Crp)
    w2_k = jnp.pad(w2.astype(jnp.float32).T, ((0, Crp - Cr), (0, 0)))                 # (Crp, C)
    b2_k = b2.astype(jnp.float32).reshape(1, C)

    mp = _tpu_memory_params()
    bytes_per_image = C * HW * x.dtype.itemsize
    Bt = _choose_batch_tile(B, bytes_per_image, mp["max_block_bytes"], mp["min_grid_steps"])
    grid = (B // Bt,)

    # VMEM feasibility: the in and out x blocks are each double-buffered by the
    # pipeline, plus the (tiny) resident weights.
    weight_bytes = 4 * (w1_k.size + b1_k.size + w2_k.size + b2_k.size)
    live_bytes = 4 * Bt * bytes_per_image + weight_bytes
    # TODO(synk): two-pass fallback (HW-chunked squeeze into a (Bt, C) f32 scratch,
    # then a chunked scale sweep) for feature maps whose single-image slab does not
    # fit the v7x 64 MiB VMEM budget; until then fail loudly rather than spill.
    if live_bytes > mp["vmem_limit_bytes"]:
        raise ValueError(
            f"SEBlock feature map too large for the single-pass kernel on this TPU: "
            f"~{live_bytes >> 20} MiB live VMEM needed, limit "
            f"{mp['vmem_limit_bytes'] >> 20} MiB."
        )

    # NOTE: if the grid ends up very short on v7x, pipeline_mode=pl.Buffered(3)
    # on the x/out BlockSpecs is a sweep candidate (adds one more block to the
    # VMEM budget); not enabled by default.
    out = pl.pallas_call(
        se_kernel,
        out_shape=jax.ShapeDtypeStruct((B, C, HW), x_nchw.dtype),
        grid_spec=pltpu.PrefetchScalarGridSpec(
            num_scalar_prefetch=0,
            grid=grid,
            in_specs=[
                pl.BlockSpec((Bt, C, HW), lambda g: (g, 0, 0)),
                pl.BlockSpec((C, Crp), lambda g: (0, 0)),
                pl.BlockSpec((1, Crp), lambda g: (0, 0)),
                pl.BlockSpec((Crp, C), lambda g: (0, 0)),
                pl.BlockSpec((1, C), lambda g: (0, 0)),
            ],
            out_specs=pl.BlockSpec((Bt, C, HW), lambda g: (g, 0, 0)),
        ),
        compiler_params=pltpu.CompilerParams(
            dimension_semantics=("parallel",),
            vmem_limit_bytes=mp["vmem_limit_bytes"],
        ),
    )(x, w1_k, b1_k, w2_k, b2_k)

    return out.reshape(B, C, H, W)


def se_block_ref(x, w1, b1, w2, b2):
    """Pure-JAX reference matching the PyTorch forward exactly."""
    B, C, _, _ = x.shape
    y = x.reshape(B, C, -1).mean(axis=2)                      # (B, C)
    y = jax.nn.relu(y @ w1.T + b1)                            # (B, C//r)
    y = jax.nn.sigmoid(y @ w2.T + b2)                         # (B, C)
    return x * y[:, :, None, None]


if __name__ == "__main__":
    # Small shapes consistent with the module: channels divisible by reduction=16.
    B, C, H, W = 2, 32, 16, 16
    reduction = 16
    Cr = C // reduction

    key = jax.random.PRNGKey(0)
    kx, kw1, kb1, kw2, kb2 = jax.random.split(key, 5)

    x = jax.random.normal(kx, (B, C, H, W), dtype=jnp.float32)
    # Deterministic synthetic parameters (nn.Linear shapes: weight (out, in), bias (out,)).
    w1 = jax.random.normal(kw1, (Cr, C), dtype=jnp.float32) * 0.1
    b1 = jax.random.normal(kb1, (Cr,), dtype=jnp.float32) * 0.1
    w2 = jax.random.normal(kw2, (C, Cr), dtype=jnp.float32) * 0.1
    b2 = jax.random.normal(kb2, (C,), dtype=jnp.float32) * 0.1

    out = jax.block_until_ready(se_block(x, w1, b1, w2, b2))
    ref = jax.block_until_ready(se_block_ref(x, w1, b1, w2, b2))

    assert out.shape == (B, C, H, W)
    assert jnp.allclose(out, ref, atol=2e-5, rtol=2e-5), "mismatch vs reference"
    print("KERNEL_OK")
</pallas_src>

<mosaic_0001>
module attributes {stable_mosaic.version = 11 : i64} {
  func.func @se_kernel(%arg0: i32, %arg1: memref<2x32x256xf32, #tpu.memory_space<vmem>>, %arg2: memref<32x128xf32, #tpu.memory_space<vmem>>, %arg3: memref<1x128xf32, #tpu.memory_space<vmem>>, %arg4: memref<128x32xf32, #tpu.memory_space<vmem>>, %arg5: memref<1x32xf32, #tpu.memory_space<vmem>>, %arg6: memref<2x32x256xf32, #tpu.memory_space<vmem>>) attributes {dimension_semantics = [#tpu.dimension_semantics<parallel>], iteration_bounds = array<i64: 1>, scalar_prefetch = 0 : i64, scratch_operands = 0 : i64, tpu.core_type = #tpu.core_type<tc>, window_params = [{transform_indices = @transform_0, window_bounds = array<i64: 2, 32, 256>}, {pipeline_mode = #tpu.pipeline_mode<synchronous>, transform_indices = @transform_1, window_bounds = array<i64: 32, 128>}, {pipeline_mode = #tpu.pipeline_mode<synchronous>, transform_indices = @transform_2, window_bounds = array<i64: 1, 128>}, {pipeline_mode = #tpu.pipeline_mode<synchronous>, transform_indices = @transform_3, window_bounds = array<i64: 128, 32>}, {pipeline_mode = #tpu.pipeline_mode<synchronous>, transform_indices = @transform_4, window_bounds = array<i64: 1, 32>}, {transform_indices = @transform_5, window_bounds = array<i64: 2, 32, 256>}]} {
    %c0 = arith.constant 0 : index
    %c0_0 = arith.constant 0 : index
    %c0_1 = arith.constant 0 : index
    %0 = vector.load %arg1[%c0, %c0_0, %c0_1] : memref<2x32x256xf32, #tpu.memory_space<vmem>>, vector<2x32x256xf32>
    %cst = arith.constant dense<0.000000e+00> : vector<2x32xf32>
    %1 = vector.multi_reduction <add>, %0, %cst [2] : vector<2x32x256xf32> to vector<2x32xf32>
    %c0_2 = arith.constant 0 : index
    %c0_3 = arith.constant 0 : index
    %2 = vector.load %arg2[%c0_2, %c0_3] : memref<32x128xf32, #tpu.memory_space<vmem>>, vector<32x128xf32>
    %cst_4 = arith.constant dense<0.000000e+00> : vector<2x128xf32>
    %3 = tpu.matmul %1, %2, %cst_4 {dimension_numbers = #tpu.dot_dimension_numbers<[1], [0], [0], [1], [0, 0, 1, 1], [], []>} : vector<2x32xf32>, vector<32x128xf32>, vector<2x128xf32> -> vector<2x128xf32>
    %c0_5 = arith.constant 0 : index
    %c0_6 = arith.constant 0 : index
    %4 = vector.load %arg3[%c0_5, %c0_6] : memref<1x128xf32, #tpu.memory_space<vmem>>, vector<1x128xf32>
    %5 = vector.broadcast %4 : vector<1x128xf32> to vector<2x128xf32>
    %6 = arith.addf %3, %5 : vector<2x128xf32>
    %cst_7 = arith.constant 0.000000e+00 : f32
    %7 = vector.broadcast %cst_7 : f32 to vector<2x128xf32>
    %8 = arith.maximumf %6, %7 : vector<2x128xf32>
    %c0_8 = arith.constant 0 : index
    %c0_9 = arith.constant 0 : index
    %9 = vector.load %arg4[%c0_8, %c0_9] : memref<128x32xf32, #tpu.memory_space<vmem>>, vector<128x32xf32>
    %cst_10 = arith.constant dense<0.000000e+00> : vector<2x32xf32>
    %10 = tpu.matmul %8, %9, %cst_10 {dimension_numbers = #tpu.dot_dimension_numbers<[1], [0], [0], [1], [0, 0, 1, 1], [], []>} : vector<2x128xf32>, vector<128x32xf32>, vector<2x32xf32> -> vector<2x32xf32>
    %c0_11 = arith.constant 0 : index
    %c0_12 = arith.constant 0 : index
    %11 = vector.load %arg5[%c0_11, %c0_12] : memref<1x32xf32, #tpu.memory_space<vmem>>, vector<1x32xf32>
    %12 = vector.broadcast %11 : vector<1x32xf32> to vector<2x32xf32>
    %13 = arith.addf %10, %12 : vector<2x32xf32>
    %14 = arith.negf %13 : vector<2x32xf32>
    %15 = math.exp %14 : vector<2x32xf32>
    %cst_13 = arith.constant 1.000000e+00 : f32
    %16 = vector.broadcast %cst_13 : f32 to vector<2x32xf32>
    %17 = arith.addf %16, %15 : vector<2x32xf32>
    %18 = arith.divf %16, %17 : vector<2x32xf32>
    %19 = vector.shape_cast %18 : vector<2x32xf32> to vector<2x32x1xf32>
    %c0_14 = arith.constant 0 : index
    %c0_15 = arith.constant 0 : index
    %c0_16 = arith.constant 0 : index
    %20 = vector.load %arg1[%c0_14, %c0_15, %c0_16] : memref<2x32x256xf32, #tpu.memory_space<vmem>>, vector<2x32x256xf32>
    %21 = vector.broadcast %19 : vector<2x32x1xf32> to vector<2x32x256xf32>
    %22 = arith.mulf %20, %21 : vector<2x32x256xf32>
    %c0_17 = arith.constant 0 : index
    %c0_18 = arith.constant 0 : index
    %c0_19 = arith.constant 0 : index
    %23 = vector.load %arg6[%c0_17, %c0_18, %c0_19] : memref<2x32x256xf32, #tpu.memory_space<vmem>>, vector<2x32x256xf32>
    tpu.vector_store %arg6[%c0_17, %c0_18, %c0_19], %22 {strides = array<i32>} : memref<2x32x256xf32, #tpu.memory_space<vmem>>, vector<2x32x256xf32>,
    return
  }
  func.func @transform_0(%arg0: i32) -> (i32, i32, i32) {
    %c0_i32 = arith.constant 0 : i32
    %c0_i32_0 = arith.constant 0 : i32
    %c0_i32_1 = arith.constant 0 : i32
    return %arg0, %c0_i32, %c0_i32_0 : i32, i32, i32
  }
  func.func @transform_1(%arg0: i32) -> (i32, i32) {
    %c0_i32 = arith.constant 0 : i32
    %c0_i32_0 = arith.constant 0 : i32
    %c0_i32_1 = arith.constant 0 : i32
    return %c0_i32, %c0_i32_0 : i32, i32
  }
  func.func @transform_2(%arg0: i32) -> (i32, i32) {
    %c0_i32 = arith.constant 0 : i32
    %c0_i32_0 = arith.constant 0 : i32
    %c0_i32_1 = arith.constant 0 : i32
    return %c0_i32, %c0_i32_0 : i32, i32
  }
  func.func @transform_3(%arg0: i32) -> (i32, i32) {
    %c0_i32 = arith.constant 0 : i32
    %c0_i32_0 = arith.constant 0 : i32
    %c0_i32_1 = arith.constant 0 : i32
    return %c0_i32, %c0_i32_0 : i32, i32
  }
  func.func @transform_4(%arg0: i32) -> (i32, i32) {
    %c0_i32 = arith.constant 0 : i32
    %c0_i32_0 = arith.constant 0 : i32
    %c0_i32_1 = arith.constant 0 : i32
    return %c0_i32, %c0_i32_0 : i32, i32
  }
  func.func @transform_5(%arg0: i32) -> (i32, i32, i32) {
    %c0_i32 = arith.constant 0 : i32
    %c0_i32_0 = arith.constant 0 : i32
    %c0_i32_1 = arith.constant 0 : i32
    return %arg0, %c0_i32, %c0_i32_0 : i32, i32, i32
  }
}

</mosaic_0001>

<bundles_post_ra>
// kernel: tpu_custom_call.1
= control target key start
LH: loop header
LB: loop body
LE: loop exit
PB: predicated region body
PF: predicated region fallthrough
CT: control target
= control target key end

     0   :  { %s544_s0 = inlined_call_operand.vmem [shape: f32[2,32,256], index: 0, kind: input, shape index: {}]   ;;  %s545_s1 = inlined_call_operand.vmem [shape: f32[32,128], index: 1, kind: input, shape index: {}]   ;;  %s546_s2 = inlined_call_operand.vmem [shape: f32[1,128], index: 2, kind: input, shape index: {}]   ;;  %s547_s3 = inlined_call_operand.vmem [shape: f32[128,32], index: 3, kind: input, shape index: {}]   ;;  %s548_s4 = inlined_call_operand.vmem [shape: f32[1,32], index: 4, kind: input, shape index: {}]   ;;  %s549_s5 = inlined_call_operand.hbm [shape: f32[2,32,256], index: 5, kind: output, shape index: {}]  }
   0x1   :  { %v366_v0 = vld [vmem:[%s544_s0 + $0x40] sm:$0xff]  ;;  %v371_v1 = vld [vmem:[%s544_s0 + $0x48] sm:$0xff]  ;;  %v402_v9 = vld [vmem:[%s544_s0 + $0x50] sm:$0xff] }
   0x2   :  { %v376_v2 = vld [vmem:[%s544_s0] sm:$0xff]  ;;  %v49_v3 = vadd.f32 %v371_v1, %v366_v0  ;;  %v383_v4 = vld [vmem:[%s544_s0 + $0x8] sm:$0xff]  ;;  %v407_v10 = vld [vmem:[%s544_s0 + $0x58] sm:$0xff] }
   0x3   :  { %v388_v5 = vld [vmem:[%s544_s0 + $0x20] sm:$0xff]  ;;  %v393_v6 = vld [vmem:[%s544_s0 + $0x28] sm:$0xff]  ;;  %v37_v7 = vadd.f32 %v383_v4, %v376_v2  ;;  %v412_v11 = vld [vmem:[%s544_s0 + $0x10] sm:$0xff] }
   0x4   :  { %v43_v8 = vadd.f32 %v393_v6, %v388_v5  ;;  %50 = vadd.xlane.f32.xlu1 %v49_v3  ;;  %v417_v12 = vld [vmem:[%s544_s0 + $0x18] sm:$0xff]  ;;  %v422_v13 = vld [vmem:[%s544_s0 + $0x60] sm:$0xff]  ;;  %v427_v14 = vld [vmem:[%s544_s0 + $0x68] sm:$0xff] }
   0x5   :  { %38 = vadd.xlane.f32.xlu0 %v37_v7 }
   0x6   :  { %44 = vadd.xlane.f32.xlu2 %v43_v8 }
   0x7   :  { %10 = vsyncpa [#allocation3], 0  ;;  %v52_v15 = vadd.f32 %v407_v10, %v402_v9  ;;  %v40_v16 = vadd.f32 %v417_v12, %v412_v11  ;;  %v55_v17 = vadd.f32 %v427_v14, %v422_v13  ;;  %v438_v18 = vld [vmem:[%s544_s0 + $0x70] sm:$0xff]  ;;  %v443_v19 = vld [vmem:[%s544_s0 + $0x78] sm:$0xff]  ;;  %v77_v36 = vlaneseq  ;;  %s272_s16 = sshll.u32 %s549_s5, 4  ;;  %s331_s17 = smov 256   ;;  %s273_s16 = int_to_ptr.hbm [resolvable:$true] %s272_s16 }
   0x8   :  { %v448_v20 = vld [vmem:[%s544_s0 + $0x30] sm:$0xff]  ;;  %v453_v21 = vld [vmem:[%s544_s0 + $0x38] sm:$0xff]  ;;  %v58_v22 = vadd.f32 %v443_v19, %v438_v18  ;;  %v62_v26 = vld [vmem:[%s545_s1 + $0x8] sm:$0xff]  ;;  %vm82_vm0 = vcmask 130112   ;;  %vm86_vm1 = vcmask 195712   ;;  %vm90_vm2 = vcmask 261312  }
   0x9   :  { %v46_v23 = vadd.f32 %v453_v21, %v448_v20  ;;  %v64_v24 = vld [vmem:[%s545_s1 + $0x18] sm:$0xff]  ;;  %v63_v25 = vld [vmem:[%s545_s1 + $0x10] sm:$0xff]  ;;  %v61_v27 = vld [vmem:[%s545_s1] sm:$0xff]  ;;  %v78_v41 = vand.u32 127, %v77_v36  ;;  %vm99_vm3 = vcmask 1041409   ;;  %vm101_vm4 = vcmask 261120  }
   0xa   :  { %116 = vmatpush.msra.mxu0 %v64_v24  ;;  %v140_v28 = vld [vmem:[%s547_s3 + $0x78] sm:$0xff]  ;;  %v139_v29 = vld [vmem:[%s547_s3 + $0x70] sm:$0xff]  ;;  %v138_v30 = vld [vmem:[%s547_s3 + $0x68] sm:$0xff]  ;;  %s332_s18 = smov 16  }
   0xb   :  { %145 = vmatpush.msra.mxu1 %v140_v28  ;;  %v137_v31 = vld [vmem:[%s547_s3 + $0x60] sm:$0xff]  ;;  %v136_v32 = vld [vmem:[%s547_s3 + $0x58] sm:$0xff]  ;;  %v135_v33 = vld [vmem:[%s547_s3 + $0x50] sm:$0xff]  ;;  %v80_v43 = vadd.s32 4294967288, %v78_v41  ;;  %v84_v50 = vadd.s32 4294967280, %v78_v41  ;;  %v88_v54 = vadd.s32 4294967272, %v78_v41 }
   0xc   :  { %53 = vadd.xlane.f32.xlu1 %v52_v15  ;;  %117 = vmatpush.msra.mxu0 %v63_v25  ;;  %v134_v35 = vld [vmem:[%s547_s3 + $0x48] sm:$0xff]  ;;  %v133_v39 = vld [vmem:[%s547_s3 + $0x40] sm:$0xff]  ;;  %v132_v40 = vld [vmem:[%s547_s3 + $0x38] sm:$0xff]  ;;  %v186_v28 = vshrl.u32 %v77_v36, 7 }
   0xd   :  { %41 = vadd.xlane.f32.xlu0 %v40_v16  ;;  %146 = vmatpush.msra.mxu1 %v139_v29  ;;  %v131_v42 = vld [vmem:[%s547_s3 + $0x30] sm:$0xff]  ;;  %v130_v45 = vld [vmem:[%s547_s3 + $0x28] sm:$0xff]  ;;  %v129_v47 = vld [vmem:[%s547_s3 + $0x20] sm:$0xff] }
   0xe   :  { %56 = vadd.xlane.f32.xlu2 %v55_v17  ;;  %118 = vmatpush.msra.mxu0 %v62_v26  ;;  %v128_v52 = vld [vmem:[%s547_s3 + $0x18] sm:$0xff]  ;;  %v127_v17 = vld [vmem:[%s547_s3 + $0x10] sm:$0xff]  ;;  %v298_v24 = vld [vmem:[%s546_s2] ss:$0 sm:$0xff]  ;;  %v199_v29 = vadd.s32 16, %v186_v28  ;;  %s330_s2 = smov [#allocation2]  }
   0xf   :  { %147 = vmatpush.msra.mxu1 %v138_v30  ;;  %289 = vset.pattern.permute.xlu2 %v186_v28  ;;  %v193_v30 = vadd.s32 8, %v186_v28 }
  0x10   :  { %119 = vmatpush.msra.mxu0 %v61_v27  ;;  %291 = vset.pattern.permute.xlu1 %v199_v29 }
  0x11   :  { %148 = vmatpush.msra.mxu1 %v137_v31  ;;  %290 = vset.pattern.permute.xlu0 %v193_v30  ;;  %v299_v31 = vld [vmem:[%s548_s4] ss:$0 sm:$0xff] }
  0x13   :  { %149 = vmatpush.msra.mxu1 %v136_v32 }
  0x14   :  { %59 = vadd.xlane.f32.xlu1 %v58_v22  ;;  %v126_v22 = vld [vmem:[%s547_s3 + $0x8] sm:$0xff] }
  0x15   :  { %47 = vadd.xlane.f32.xlu0 %v46_v23  ;;  %150 = vmatpush.msra.mxu1 %v135_v33  ;;  %v125_v23 = vld [vmem:[%s547_s3] sm:$0xff]  ;;  %s270_s3 = sshll.u32 %s330_s2, 4  ;;  %s271_s3 = int_to_ptr.vmem [resolvable:$true] %s270_s3 }
  0x17   :  { %151 = vmatpush.msra.mxu1 %v134_v35 }
  0x19   :  { %152 = vmatpush.msra.mxu1 %v133_v39 }
  0x1b   :  { %153 = vmatpush.msra.mxu1 %v132_v40 }
  0x1d   :  { %154 = vmatpush.msra.mxu1 %v131_v42 }
  0x1f   :  { %155 = vmatpush.msra.mxu1 %v130_v45 }
  0x21   :  { %156 = vmatpush.msra.mxu1 %v129_v47 }
  0x23   :  { %157 = vmatpush.msra.mxu1 %v128_v52 }
  0x25   :  { %158 = vmatpush.msra.mxu1 %v127_v17 }
  0x27   :  { %159 = vmatpush.msra.mxu1 %v126_v22 }
  0x29   :  { %160 = vmatpush.msra.mxu1 %v125_v23 }
  0x77   :  { %v51_v34 = vpop.xlane.xlu1 %50 }
  0x78   :  { %v39_v37 = vpop.xlane.xlu0 %38  ;;  %v92_v53 = vperm.slane %v51_v34, %v78_v41 }
  0x79   :  { %v45_v38 = vpop.xlane.xlu2 %44  ;;  %v79_v55 = vperm.slane %v39_v37, %v78_v41 }
  0x7a   :  { %v85_v60 = vperm.slane %v45_v38, %v84_v50 }
  0x7f   :  { %v54_v44 = vpop.xlane.xlu1 %53 }
  0x80   :  { %v42_v46 = vpop.xlane.xlu0 %41  ;;  %v93_v48 = vperm.slane %v54_v44, %v80_v43 }
  0x81   :  { %v57_v49 = vpop.xlane.xlu2 %56  ;;  %v81_v51 = vperm.slane %v42_v46, %v80_v43 }
  0x82   :  { %v95_v56 = vperm.slane %v57_v49, %v84_v50  ;;  %v94_v57 = vsel %vm82_vm0, %v93_v48, %v92_v53  ;;  %v205_v48 = vadd.s32 24, %v186_v28 }
  0x83   :  { %v83_v58 = vsel %vm82_vm0, %v81_v51, %v79_v55 }
  0x84   :  { %v96_v63 = vsel %vm86_vm1, %v95_v56, %v94_v57  ;;  %v87_v7 = vsel %vm86_vm1, %v85_v60, %v83_v58 }
  0x87   :  { %v60_v59 = vpop.xlane.xlu1 %59 }
  0x88   :  { %v97_v61 = vperm.slane %v60_v59, %v88_v54  ;;  %v48_v62 = vpop.xlane.xlu0 %47 }
  0x89   :  { %v89_v3 = vperm.slane %v48_v62, %v88_v54 }
  0x8a   :  { %v98_v8 = vsel %vm90_vm2, %v97_v61, %v96_v63 }
  0x8b   :  { %v91_v15 = vsel %vm90_vm2, %v89_v3, %v87_v7 }
  0x8c   :  { %v100_v16 = vsel %vm99_vm3, %v98_v8, %v91_v15 }
  0x8d   :  { %284 = vmatmul.msk.f32.vlgmr.msra.gmra.mxu0 %vm101_vm4, %v100_v16 }
 0x10a   :  { %v121_v25 = vpop.f32.mrf.mxu0 }
 0x10b   :  { %v122_v26 = vadd.f32 %v298_v24, %v121_v25 }
 0x10d   :  { %v124_v27 = vmax.f32 %v122_v26, 0.0 }
 0x10f   :  { %161 = vmatmul.f32.vlgmr.msra.gmra.mxu1 %v124_v27 }
 0x18c   :  { %v162_v32 = vpop.f32.mrf.mxu1 }
 0x18d   :  { %v163_v33 = vadd.f32 %v299_v31, %v162_v32 }
 0x18f   :  { %v285_v34 = vmul.f32 -1.442695, %v163_v33 }
 0x191   :  { %300 = vpow2.f32 %v285_v34 }
 0x197   :  { %v301_v35 = vpop.eup %300 }
 0x198   :  { %v168_v37 = vadd.f32 1.0, %v301_v35 }
 0x19a   :  { %302 = vrcp.f32 %v168_v37  ;;  %v180_v36 = vand.u32 2147483648, %v168_v37  ;;  %v178_v42 = vand.u32 2147483647, %v168_v37  ;;  %vm174_vm6 = vweird.f32 %v168_v37 }
 0x19c   :  { %v181_v44 = vor.u32 1.1754944e-38, %v180_v36  ;;  %vm179_vm8 = vcmp.eq.f32.partialorder %v178_v42, 8.507059e+37 }
 0x1a0   :  { %v303_v38 = vpop.eup %302 }
 0x1a1   :  { %v170_v39 = vmul.f32 %v303_v38, %v168_v37  ;;  %vm175_vm5 = vweird.f32 %v303_v38 }
 0x1a2   :  { %vm176_vm7 = vmor %vm174_vm6, %vm175_vm5 }
 0x1a3   :  { %v171_v40 = vsub.f32 1.0, %v170_v39 }
 0x1a5   :  { %v172_v41 = vmul.f32 %v303_v38, %v171_v40 }
 0x1a7   :  { %v173_v43 = vadd.f32 %v303_v38, %v172_v41 }
 0x1a9   :  { %v177_v45 = vsel %vm176_vm7, %v303_v38, %v173_v43 }
 0x1aa   :  { %v182_v46 = vsel %vm179_vm8, %v181_v44, %v177_v45 }
 0x1ab   :  { %v184_v47 = vperm.slane %v182_v46, 0  ;;  %v209_v49 = vperm.slane %v182_v46, 1 }
 0x1ad   :  { %201 = vperm.xlu1 %291, %v184_v47   ;;  %195 = vperm.xlu0 %290, %v184_v47  }
 0x1ae   :  { %189 = vperm.xlu2 %289, %v184_v47  }
 0x1b5   :  { %294 = vset.pattern.permute.xlu1 %v193_v30  ;;  %297 = vset.pattern.permute.xlu0 %v205_v48 }
 0x1b6   :  { %292 = vset.pattern.permute.xlu2 %v205_v48 }
 0x1bd   :  { %220 = vperm.xlu1 %294, %v209_v49  }
 0x1be   :  { %207 = vperm.xlu2 %292, %v184_v47  }
 0x1c5   :  { %296 = vset.pattern.permute.xlu1 %v205_v48 }
 0x1c6   :  { %293 = vset.pattern.permute.xlu2 %v186_v28 }
 0x1cd   :  { %232 = vperm.xlu1 %296, %v209_v49  }
 0x1ce   :  { %214 = vperm.xlu2 %293, %v209_v49  }
 0x1d6   :  { %295 = vset.pattern.permute.xlu2 %v199_v29 }
 0x1de   :  { %226 = vperm.xlu2 %295, %v209_v49  }
 0x208   :  { %v190_v50 = vpop.permute.xlu2 %189 }
 0x209   :  { %v234_v51 = vmul.f32 %v190_v50, %v376_v2  ;;  %v235_v52 = vmul.f32 %v190_v50, %v383_v4 }
 0x20b   :  { %250 = vst [vmem:[#allocation2] sm:$0xff] %v234_v51 }
 0x20c   :  { %251 = vst [vmem:[#allocation2 + $0x8] sm:$0xff] %v235_v52 }
 0x218   :  { %v208_v53 = vpop.permute.xlu2 %207 }
 0x219   :  { %v240_v54 = vmul.f32 %v208_v53, %v448_v20  ;;  %v241_v55 = vmul.f32 %v208_v53, %v453_v21 }
 0x21b   :  { %256 = vst [vmem:[#allocation2 + $0x30] sm:$0xff] %v240_v54 }
 0x21c   :  { %257 = vst [vmem:[#allocation2 + $0x38] sm:$0xff] %v241_v55 }
 0x21f   :  { %v202_v56 = vpop.permute.xlu1 %201  ;;  %v196_v57 = vpop.permute.xlu0 %195 }
 0x220   :  { %v238_v58 = vmul.f32 %v202_v56, %v388_v5  ;;  %v239_v59 = vmul.f32 %v202_v56, %v393_v6  ;;  %v236_v60 = vmul.f32 %v196_v57, %v412_v11  ;;  %v237_v2 = vmul.f32 %v196_v57, %v417_v12 }
 0x222   :  { %254 = vst [vmem:[#allocation2 + $0x20] sm:$0xff] %v238_v58 }
 0x223   :  { %255 = vst [vmem:[#allocation2 + $0x28] sm:$0xff] %v239_v59 }
 0x224   :  { %252 = vst [vmem:[#allocation2 + $0x10] sm:$0xff] %v236_v60 }
 0x225   :  { %253 = vst [vmem:[#allocation2 + $0x18] sm:$0xff] %v237_v2 }
 0x228   :  { %v215_v4 = vpop.permute.xlu2 %214 }
 0x229   :  { %v242_v20 = vmul.f32 %v215_v4, %v366_v0  ;;  %v243_v21 = vmul.f32 %v215_v4, %v371_v1 }
 0x22b   :  { %258 = vst [vmem:[#allocation2 + $0x40] sm:$0xff] %v242_v20 }
 0x22c   :  { %259 = vst [vmem:[#allocation2 + $0x48] sm:$0xff] %v243_v21 }
 0x22f   :  { %v221_v61 = vpop.permute.xlu1 %220 }
 0x230   :  { %v244_v5 = vmul.f32 %v221_v61, %v402_v9  ;;  %v245_v6 = vmul.f32 %v221_v61, %v407_v10 }
 0x232   :  { %260 = vst [vmem:[#allocation2 + $0x50] sm:$0xff] %v244_v5 }
 0x233   :  { %261 = vst [vmem:[#allocation2 + $0x58] sm:$0xff] %v245_v6 }
 0x238   :  { %v227_v11 = vpop.permute.xlu2 %226 }
 0x239   :  { %v246_v12 = vmul.f32 %v227_v11, %v422_v13  ;;  %v247_v62 = vmul.f32 %v227_v11, %v427_v14 }
 0x23b   :  { %262 = vst [vmem:[#allocation2 + $0x60] sm:$0xff] %v246_v12 }
 0x23c   :  { %263 = vst [vmem:[#allocation2 + $0x68] sm:$0xff] %v247_v62 }
 0x23f   :  { %v233_v0 = vpop.permute.xlu1 %232 }
 0x240   :  { %v248_v1 = vmul.f32 %v233_v0, %v438_v18  ;;  %v249_v9 = vmul.f32 %v233_v0, %v443_v19 }
 0x242   :  { %264 = vst [vmem:[#allocation2 + $0x70] sm:$0xff] %v248_v1 }
 0x243   :  { %265 = vst [vmem:[#allocation2 + $0x78] sm:$0xff] %v249_v9 }
 0x244   :  { %278 = dma.vmem_to_hbm [thread:$0]  %s271_s3, 2048, %s273_s16, [#allocation3], %s331_s17, %s331_s17, %s332_s18  }
 0x245   :  { %328 = dma.done.wait [#allocation3], 2048  }
 0x246   :  { %329 = vsyncadd [#allocation3], 4294965248 }
 0x247   :  { %283 = vsyncpa [#allocation3], 1 }

</bundles_post_ra>
